<compile_context>
chip_gen: v7x
topology: tpu7x:2x2x1
jax: 0.10.0
libtpu: 0.0.40
codegen_flags: <defaults>
</compile_context>

<pallas_src>
import functools

import jax
import jax.numpy as jnp
from jax.experimental import pallas as pl
from jax.experimental.pallas import tpu as pltpu

LANES = 128
TILE_ROWS = 1024      # rows of 128 lanes per grid step (512 KiB f32 per input block)
NCORES = 2            # leading "parallel" axis -> both TensorCores on v7x


def _round_up(x, m):
    return ((x + m - 1) // m) * m


def _mse_sum_kernel(rows_total, tile_rows, needs_mask, a_ref, b_ref, o_ref):
    """Accumulate per-element squared differences into the resident output block."""
    c = pl.program_id(0)            # row-range split (megacore parallel axis)
    i = pl.program_id(1)            # sequential blocks within this split
    inner = pl.num_programs(1)

    @pl.when(i == 0)
    def _():
        o_ref[...] = jnp.zeros_like(o_ref)

    d = a_ref[...].astype(jnp.float32) - b_ref[...].astype(jnp.float32)
    sq = d * d

    if needs_mask:  # static (trace-time) decision
        g = c * inner + i           # global block index (unclamped)
        row_ids = g * tile_rows + jax.lax.broadcasted_iota(
            jnp.int32, (tile_rows, LANES), 0)
        sq = jnp.where(row_ids < rows_total, sq, jnp.float32(0.0))

    o_ref[...] += sq                # pure VALU accumulation, no XLU / SMEM


def transform_loss(f_in, f_target):
    """MSE loss: mean((f_in - f_target) ** 2), matching TransformLoss.forward."""
    assert f_in.ndim == f_target.ndim, "inconsistent dimensions"
    assert f_in.shape == f_target.shape

    total = 1
    for s in f_in.shape:
        total *= s

    a_flat = f_in.reshape(-1)
    b_flat = f_target.reshape(-1)

    rows = total // LANES
    rem = total - rows * LANES

    # Tiny (<128 element) tail handled in plain JAX (no full-array pad copies).
    tail_sum = jnp.float32(0.0)
    if rem:
        da = (a_flat[rows * LANES:].astype(jnp.float32)
              - b_flat[rows * LANES:].astype(jnp.float32))
        tail_sum = jnp.sum(da * da)

    if rows == 0:  # degenerate tiny input: nothing for the kernel to stream
        return tail_sum / jnp.float32(total)

    a2 = a_flat[: rows * LANES].reshape(rows, LANES)
    b2 = b_flat[: rows * LANES].reshape(rows, LANES)

    # Shrink the tile for small inputs; keep a multiple of 32 sublanes so
    # bf16 / int8 packing constraints are respected.
    tile_rows = min(TILE_ROWS, _round_up(rows, 32))

    n_blocks = pl.cdiv(rows, tile_rows)          # real (possibly partial-last) blocks
    inner = pl.cdiv(n_blocks, NCORES)            # blocks per core split
    needs_mask = (NCORES * inner * tile_rows) != rows

    def block_map(c, i):
        # Clamp so phantom / trailing block indices never DMA past the array;
        # their contribution is zeroed by the in-kernel row mask.
        return (jnp.minimum(c * inner + i, n_blocks - 1), 0)

    itemsize = jnp.dtype(f_in.dtype).itemsize
    cost = pl.CostEstimate(
        flops=3 * rows * LANES,
        transcendentals=0,
        bytes_accessed=2 * rows * LANES * itemsize
        + NCORES * tile_rows * LANES * 4,
    )

    partials = pl.pallas_call(
        functools.partial(_mse_sum_kernel, rows, tile_rows, needs_mask),
        out_shape=jax.ShapeDtypeStruct((NCORES * tile_rows, LANES), jnp.float32),
        grid_spec=pltpu.PrefetchScalarGridSpec(
            num_scalar_prefetch=0,
            grid=(NCORES, inner),
            in_specs=[
                pl.BlockSpec((tile_rows, LANES), block_map),
                pl.BlockSpec((tile_rows, LANES), block_map),
            ],
            out_specs=pl.BlockSpec((tile_rows, LANES), lambda c, i: (c, 0)),
        ),
        compiler_params=pltpu.CompilerParams(
            dimension_semantics=("parallel", "arbitrary"),
        ),
        cost_estimate=cost,
    )(a2, b2)

    return (jnp.sum(partials) + tail_sum) / jnp.float32(total)


if __name__ == "__main__":
    key = jax.random.PRNGKey(0)
    k1, k2 = jax.random.split(key)

    # Small NCHW shapes consistent with the module's forward.
    f_in = jax.random.normal(k1, (2, 4, 16, 16), dtype=jnp.float32)
    f_target = jax.random.normal(k2, (2, 4, 16, 16), dtype=jnp.float32)

    loss = transform_loss(f_in, f_target)
    jax.block_until_ready(loss)

    # Sanity check against a pure-JAX reference.
    ref = jnp.mean((f_in - f_target) ** 2)
    assert jnp.allclose(loss, ref, rtol=1e-5, atol=1e-6), (loss, ref)

    print("KERNEL_OK")
</pallas_src>

<mosaic_0001>
module attributes {stable_mosaic.version = 11 : i64} {
  func.func @_mse_sum_kernel(%arg0: i32, %arg1: i32, %arg2: memref<32x128xf32, #tpu.memory_space<vmem>>, %arg3: memref<32x128xf32, #tpu.memory_space<vmem>>, %arg4: memref<32x128xf32, #tpu.memory_space<vmem>>) attributes {dimension_semantics = [#tpu.dimension_semantics<parallel>, #tpu.dimension_semantics<arbitrary>], iteration_bounds = array<i64: 2, 1>, scalar_prefetch = 0 : i64, scratch_operands = 0 : i64, tpu.core_type = #tpu.core_type<tc>, window_params = [{transform_indices = @transform_0, window_bounds = array<i64: 32, 128>}, {transform_indices = @transform_1, window_bounds = array<i64: 32, 128>}, {transform_indices = @transform_2, window_bounds = array<i64: 32, 128>}]} {
    %c0_i32 = arith.constant 0 : i32
    %0 = arith.cmpi eq, %arg1, %c0_i32 : i32
    %1 = arith.extui %0 : i1 to i32
    %c0_i32_0 = arith.constant 0 : i32
    %2 = arith.cmpi ne, %1, %c0_i32_0 : i32
    scf.if %2 {
      %cst_8 = arith.constant 0.000000e+00 : f32
      %20 = vector.broadcast %cst_8 : f32 to vector<32x128xf32>
      %c0_9 = arith.constant 0 : index
      %c0_10 = arith.constant 0 : index
      %21 = vector.load %arg4[%c0_9, %c0_10] : memref<32x128xf32, #tpu.memory_space<vmem>>, vector<32x128xf32>
      tpu.vector_store %arg4[%c0_9, %c0_10], %20 {strides = array<i32>} : memref<32x128xf32, #tpu.memory_space<vmem>>, vector<32x128xf32>,
    } else {
    }
    %c0 = arith.constant 0 : index
    %c0_1 = arith.constant 0 : index
    %3 = vector.load %arg2[%c0, %c0_1] : memref<32x128xf32, #tpu.memory_space<vmem>>, vector<32x128xf32>
    %c0_2 = arith.constant 0 : index
    %c0_3 = arith.constant 0 : index
    %4 = vector.load %arg3[%c0_2, %c0_3] : memref<32x128xf32, #tpu.memory_space<vmem>>, vector<32x128xf32>
    %5 = arith.subf %3, %4 : vector<32x128xf32>
    %6 = arith.mulf %5, %5 : vector<32x128xf32>
    %c1_i32 = arith.constant 1 : i32
    %7 = arith.muli %arg0, %c1_i32 : i32
    %8 = arith.addi %7, %arg1 : i32
    %c32_i32 = arith.constant 32 : i32
    %9 = arith.muli %8, %c32_i32 : i32
    %10 = tpu.iota {dimensions = array<i32: 0>} : vector<32x128xi32>
    %11 = vector.broadcast %9 : i32 to vector<32x128xi32>
    %12 = arith.addi %11, %10 : vector<32x128xi32>
    %c16_i32 = arith.constant 16 : i32
    %13 = vector.broadcast %c16_i32 : i32 to vector<32x128xi32>
    %14 = arith.cmpi slt, %12, %13 : vector<32x128xi32>
    %cst = arith.constant 0.000000e+00 : f32
    %15 = vector.broadcast %cst : f32 to vector<32x128xf32>
    %16 = arith.select %14, %6, %15 : vector<32x128xi1>, vector<32x128xf32>
    %c0_4 = arith.constant 0 : index
    %c0_5 = arith.constant 0 : index
    %17 = vector.load %arg4[%c0_4, %c0_5] : memref<32x128xf32, #tpu.memory_space<vmem>>, vector<32x128xf32>
    %18 = arith.addf %17, %16 : vector<32x128xf32>
    %c0_6 = arith.constant 0 : index
    %c0_7 = arith.constant 0 : index
    %19 = vector.load %arg4[%c0_6, %c0_7] : memref<32x128xf32, #tpu.memory_space<vmem>>, vector<32x128xf32>
    tpu.vector_store %arg4[%c0_6, %c0_7], %18 {strides = array<i32>} : memref<32x128xf32, #tpu.memory_space<vmem>>, vector<32x128xf32>,
    return
  }
  func.func @transform_0(%arg0: i32, %arg1: i32) -> (i32, i32) {
    %c1_i32 = arith.constant 1 : i32
    %0 = arith.muli %arg0, %c1_i32 : i32
    %1 = arith.addi %0, %arg1 : i32
    %c0_i32 = arith.constant 0 : i32
    %2 = arith.minsi %1, %c0_i32 : i32
    %c0_i32_0 = arith.constant 0 : i32
    %c0_i32_1 = arith.constant 0 : i32
    return %2, %c0_i32_0 : i32, i32
  }
  func.func @transform_1(%arg0: i32, %arg1: i32) -> (i32, i32) {
    %c1_i32 = arith.constant 1 : i32
    %0 = arith.muli %arg0, %c1_i32 : i32
    %1 = arith.addi %0, %arg1 : i32
    %c0_i32 = arith.constant 0 : i32
    %2 = arith.minsi %1, %c0_i32 : i32
    %c0_i32_0 = arith.constant 0 : i32
    %c0_i32_1 = arith.constant 0 : i32
    return %2, %c0_i32_0 : i32, i32
  }
  func.func @transform_2(%arg0: i32, %arg1: i32) -> (i32, i32) {
    %c0_i32 = arith.constant 0 : i32
    %c0_i32_0 = arith.constant 0 : i32
    return %arg0, %c0_i32 : i32, i32
  }
}

</mosaic_0001>

<bundles_post_ra>
// kernel: tpu_custom_call.1
= control target key start
LH: loop header
LB: loop body
LE: loop exit
PB: predicated region body
PF: predicated region fallthrough
CT: control target
= control target key end

     0   :  { %7 = vsyncpa [#allocation3], 0  ;;  %s919_s0 = inlined_call_operand.hbm [shape: f32[16,128], index: 0, kind: input, shape index: {}]   ;;  %s920_s1 = inlined_call_operand.hbm [shape: f32[16,128], index: 1, kind: input, shape index: {}]   ;;  %s921_s2 = inlined_call_operand.hbm [shape: f32[64,128], index: 2, kind: output, shape index: {}]  }
   0x1   :  { %9 = vsyncpa [#allocation3 + $0x1], 0 }
   0x2   :  { %10 = vsyncpa [#allocation6], 0 }
   0x3   :  { %12 = vsyncpa [#allocation6 + $0x1], 0 }
   0x4   :  { %13 = vsyncpa [#allocation4], 0 }
   0x5   :  { %15 = vsyncpa [#allocation4 + $0x1], 0  ;;  %s739_s9 = smov 0   ;;  %s741_s10 = smov 0  }
   0x6   :  { %s743_s11 = smov 0   ;;  %s745_s12 = smov 0  }
   0x7   :  { %s747_s13 = smov 0   ;;  %s749_s14 = smov 0  }
   0x8   :  { %s751_s15 = smov 0   ;;  %s753_s16 = smov 0  }
   0x9 LB: > { %s427_s17 = sadd.s32 4294967295, %s713_s16   ;;  %s428_s18 = sadd.s32 4294967294, %s713_s16   ;;  %s713_s16 = sphi %s753_s16, %s21_s16   ;;  %s709_s15 = sphi %s751_s15, %s933_s15   ;;  %s705_s14 = sphi %s749_s14, %s932_s14   ;;  %s701_s13 = sphi %s747_s13, %s909_s13   ;;  %s697_s12 = sphi %s745_s12, %s931_s12   ;;  %s693_s11 = sphi %s743_s11, %s930_s11   ;;  %s689_s10 = sphi %s741_s10, %s929_s10   ;;  %s685_s9 = sphi %s739_s9, %s928_s9  }
   0xa   : > { %s33_s19 = sadd.s32 1, %s709_s15  ;;  %p682_p1 = scmp.ne.s32.totalorder %s701_s13, 0 }
   0xb   : > { %p35_p0 = scmp.ge.s32.totalorder %s33_s19, 2  ;;  %p54_p2 = scmp.eq.s32.totalorder %s713_s16, 0 }
   0xc   : > { %p59_p3 = scmp.ne.s32.totalorder %s701_s13, %s697_s12  ;;  %p60_p5 = scmp.eq.s32.totalorder %s427_s17, 0 }
   0xd   : > { %s935_s19 = smov (%p35_p0, %s33_s19), 0  ;;  %p785_p4 = por %p682_p1, %p54_p2 }
   0xe   : > { %p789_p6 = por %p60_p5, %p59_p3  ;;  %s101_s22 = ssub.s32 %s709_s15, %s935_s19 }
   0xf   : > { %p102_p7 = scmp.eq.s32.totalorder %s101_s22, 0  ;;  %s104_s23 = sadd.s32 1, %s693_s11 }
  0x10   : > { %p114_p8 = scmp.ne.s32.totalorder %s693_s11, %s689_s10  ;;  %p115_p9 = scmp.eq.s32.totalorder %s427_s17, 1 }
  0x11   : > { %s797_s24 = scalar_select %p102_p7, %s693_s11, %s104_s23  }
  0x12   : > { %p120_p10 = scmp.ne.s32.totalorder %s689_s10, %s685_s9  ;;  %p121_p11 = scmp.eq.s32.totalorder %s428_s18, 1 }
  0x13   : > { %p803_p12 = por %p115_p9, %p114_p8  ;;  %p922_p0 = scmp.ge.s32.totalorder %s713_s16, 2 }
  0x14   : > { %p807_p13 = por %p121_p11, %p120_p10 }
  0x15   : > { %137 = sbr.rel (%p922_p0) target bundleno = 82 (0x52), region = 16 }
  0x1c   : > { %140 = sbr.rel (!%p785_p4) target bundleno = 55 (0x37), region = 20 }
  0x23   : > { %154 = vsyncadd [#allocation3], 256  ;;  %s715_s27 = smov [#allocation2]   ;;  %s546_s3 = scalar_lea.hbm %s919_s0, 256 }
  0x24   : > { %s159_s28 = sshll.u32 %s715_s27, 4  ;;  %p547_p1 = scmp.ne.s32.totalorder %s919_s0, %s546_s3  ;;  %s160_s28 = int_to_ptr.vmem [resolvable:$true] %s159_s28 }
  0x25   : > { %p552_p2 = scmp.lt.u32.totalorder %s546_s3, %s546_s3  ;;  %p554_p3 = scmp.lt.u32.totalorder %s546_s3, %s919_s0 }
  0x27   : > { %p555_p5 = por %p554_p3, %p552_p2 }
  0x29   : > { %p556_p7 = pnand %p555_p5, %p547_p1 }
  0x2b   : > { %559 = shalt.err (!%p556_p7)
}
  0x2c   : > { %s560_s8 = scalar_lea.vmem %s160_s28, 256  ;;  %s566_s12 = scalar_lea.vmem %s160_s28, 1024 }
  0x2d   : > { %p561_p8 = scmp.ne.s32.totalorder %s160_s28, %s560_s8  ;;  %p567_p9 = scmp.lt.s32.totalorder %s160_s28, %s160_s28 }
  0x2e   : > { %p568_p10 = scmp.lt.s32.totalorder %s566_s12, %s560_s8 }
  0x30   : > { %p569_p11 = por %p568_p10, %p567_p9 }
  0x32   : > { %p570_p0 = pnand %p569_p11, %p561_p8 }
  0x34   : > { %573 = shalt.err (!%p570_p0)
}
  0x35   : > { %s716_s17 = smov 128   ;;  %s717_s18 = smov 8  }
  0x36   : > { %165 = dma.hbm_to_vmem [thread:$0]  %s919_s0, 256, %s160_s28, [#allocation3], %s716_s17, %s716_s17, %s717_s18  }
  0x37 PF: > { %168 = sbr.rel (!%p785_p4) target bundleno = 82 (0x52), region = 24 }
  0x3e   : > { %182 = vsyncadd [#allocation6], 256  ;;  %s718_s27 = smov [#allocation5]   ;;  %s574_s4 = scalar_lea.hbm %s920_s1, 256 }
  0x3f   : > { %s187_s29 = sshll.u32 %s718_s27, 4  ;;  %p575_p0 = scmp.ne.s32.totalorder %s920_s1, %s574_s4  ;;  %s188_s29 = int_to_ptr.vmem [resolvable:$true] %s187_s29 }
  0x40   : > { %p580_p1 = scmp.lt.u32.totalorder %s574_s4, %s574_s4  ;;  %p582_p2 = scmp.lt.u32.totalorder %s574_s4, %s920_s1 }
  0x42   : > { %p583_p3 = por %p582_p2, %p580_p1 }
  0x44   : > { %p584_p5 = pnand %p583_p3, %p575_p0 }
  0x46   : > { %587 = shalt.err (!%p584_p5)
}
  0x47   : > { %s588_s20 = scalar_lea.vmem %s188_s29, 256  ;;  %s594_s28 = scalar_lea.vmem %s188_s29, 1024 }
  0x48   : > { %p589_p4 = scmp.ne.s32.totalorder %s188_s29, %s588_s20  ;;  %p595_p7 = scmp.lt.s32.totalorder %s188_s29, %s188_s29 }
  0x49   : > { %p596_p8 = scmp.lt.s32.totalorder %s594_s28, %s588_s20 }
  0x4b   : > { %p597_p9 = por %p596_p8, %p595_p7 }
  0x4d   : > { %p598_p10 = pnand %p597_p9, %p589_p4 }
  0x4f   : > { %601 = shalt.err (!%p598_p10)
}
  0x50   : > { %s719_s12 = smov 128   ;;  %s720_s17 = smov 8  }
  0x51   : > { %193 = dma.hbm_to_vmem [thread:$0]  %s920_s1, 256, %s188_s29, [#allocation6], %s719_s12, %s719_s12, %s720_s17  }
  0x52 PF: > { %p445_p11 = scmp.ge.s32.totalorder %s713_s16, 1  ;;  %p195_p0 = scmp.lt.s32.totalorder %s713_s16, 3 }
  0x54   : > { %p196_p1 = pnand %p445_p11, %p195_p0 }
  0x55   : > { %s201_s23 = sand.u32 (!%p196_p1), 1, %s701_s13  }
  0x56   : > { %199 = sbr.rel (%p196_p1) target bundleno = 123 (0x7b), region = 28  ;;  %s446_s27 = sshll.u32 (!%p196_p1), %s201_s23, 5 }
  0x57   : > { %s202_s30 = scalar_lea.sflag (!%p196_p1), [#allocation3], %s201_s23  ;;  %s205_s3 = scalar_lea.vmem (!%p196_p1), [#allocation2], %s446_s27 }
  0x5d   : > { %667 = dma.done.wait (%p789_p6), %s202_s30, 512  }
  0x5e   : > { %669 = vsyncadd (%p789_p6), %s202_s30, 4294966784  ;;  %s211_s29 = scalar_lea.sflag [#allocation6], %s201_s23  ;;  %s214_s4 = scalar_lea.vmem [#allocation5], %s446_s27 }
  0x5f   : > { %671 = dma.done.wait (%p789_p6), %s211_s29, 512  }
  0x60   : > { %673 = vsyncadd (%p789_p6), %s211_s29, 4294966784  ;;  %s449_s5 = sshll.u32 %s705_s14, 5  ;;  %v279_v0 = vlaneseq  ;;  %s237_s6 = sand.u32 1, %s689_s10   ;;  %v261_v9 = vld [vmem:[%s205_s3] sm:$0xff]  ;;  %v262_v11 = vld [vmem:[%s205_s3 + $0x8] sm:$0xff] }
  0x61   : > { %v284_v2 = vstv %s449_s5  ;;  %s448_s7 = sshll.u32 %s237_s6, 5  ;;  %v265_v10 = vld [vmem:[%s214_s4] sm:$0xff]  ;;  %v266_v14 = vld [vmem:[%s214_s4 + $0x8] sm:$0xff]  ;;  %v263_v15 = vld [vmem:[%s205_s3 + $0x10] sm:$0xff]  ;;  %s457_s21 = sshll.u32 %s705_s14, 9 }
  0x62   : > { %v280_v1 = vshrl.u32 %v279_v0, 7  ;;  %v269_v13 = vsub.f32 %v261_v9, %v265_v10  ;;  %v267_v16 = vld [vmem:[%s214_s4 + $0x10] sm:$0xff]  ;;  %v270_v17 = vsub.f32 %v262_v11, %v266_v14  ;;  %v264_v19 = vld [vmem:[%s205_s3 + $0x18] sm:$0xff]  ;;  %s239_s8 = scalar_lea.vmem [#allocation7], %s448_s7  ;;  %s861_s17 = scalar_lea.hbm %s921_s2, %s457_s21 }
  0x63   : > { %v271_v18 = vsub.f32 %v263_v15, %v267_v16  ;;  %v268_v20 = vld [vmem:[%s214_s4 + $0x18] sm:$0xff]  ;;  %s323_s20 = sshll.u32 %s239_s8, 4  ;;  %s867_s14 = scalar_lea.sflag [#allocation4], %s237_s6  ;;  %s863_s20 = int_to_ptr.vmem [resolvable:$true] %s323_s20 }
  0x64   : > { %v281_v3 = vadd.s32 8, %v280_v1  ;;  %v282_v4 = vadd.s32 16, %v280_v1  ;;  %v283_v5 = vadd.s32 24, %v280_v1  ;;  %v285_v6 = vadd.s32 %v284_v2, %v280_v1  ;;  %s602_s18 = scalar_lea.vmem %s863_s20, 512  ;;  %s721_s22 = smov [#allocation7]  }
  0x65   : > { %v273_v21 = vmul.f32 %v269_v13, %v269_v13  ;;  %v272_v22 = vsub.f32 %v264_v19, %v268_v20  ;;  %v274_v23 = vmul.f32 %v270_v17, %v270_v17  ;;  %v275_v24 = vmul.f32 %v271_v18, %v271_v18  ;;  %p603_p6 = scmp.ne.s32.totalorder %s863_s20, %s602_s18  ;;  %s606_s23 = sshll.u32 %s721_s22, 4  ;;  %s607_s23 = int_to_ptr.vmem [resolvable:$false] %s606_s23 }
  0x66   : > { %v286_v7 = vadd.s32 %v284_v2, %v281_v3  ;;  %v287_v8 = vadd.s32 %v284_v2, %v282_v4  ;;  %v288_v12 = vadd.s32 %v284_v2, %v283_v5  ;;  %vm289_vm0 = vcmp.lt.s32.totalorder %v285_v6, 16  ;;  %s608_s27 = scalar_lea.vmem %s607_s23, 1024  ;;  %p609_p5 = scmp.lt.s32.totalorder %s863_s20, %s607_s23 }
  0x67   : > { %v293_v25 = vsel %vm289_vm0, %v273_v21, 0.0  ;;  %v276_v26 = vmul.f32 %v272_v22, %v272_v22  ;;  %p604_p2 = pnand %p603_p6, %p803_p12  ;;  %p610_p4 = scmp.lt.s32.totalorder %s608_s27, %s602_s18 }
  0x68   : > { %vm290_vm1 = vcmp.lt.s32.totalorder %v286_v7, 16  ;;  %vm291_vm2 = vcmp.lt.s32.totalorder %v287_v8, 16  ;;  %vm292_vm3 = vcmp.lt.s32.totalorder %v288_v12, 16  ;;  %305 = vst [vmem:[%s239_s8] sm:$0xff] %v293_v25 }
  0x69   : > { %v294_v27 = vsel %vm290_vm1, %v274_v23, 0.0  ;;  %v295_v28 = vsel %vm291_vm2, %v275_v24, 0.0  ;;  %v296_v29 = vsel %vm292_vm3, %v276_v26, 0.0  ;;  %p605_p3 = pneg %p604_p2  ;;  %p611_p7 = por %p610_p4, %p609_p5 }
  0x6a   : > { %306 = vst [vmem:[%s239_s8 + $0x8] sm:$0xff] %v294_v27  ;;  %307 = vst [vmem:[%s239_s8 + $0x10] sm:$0xff] %v295_v28 }
  0x6b   : > { %308 = vst [vmem:[%s239_s8 + $0x18] sm:$0xff] %v296_v29  ;;  %p612_p8 = pnand %p611_p7, %p605_p3 }
  0x6d   : > { %615 = shalt.err (!%p612_p8)
}
  0x6e   : > { %s616_s30 = scalar_lea.hbm %s861_s17, 512  ;;  %s620_s4 = scalar_lea.hbm %s921_s2, 1024 }
  0x6f   : > { %p617_p9 = scmp.ne.s32.totalorder %s861_s17, %s616_s30  ;;  %p621_p0 = scmp.lt.u32.totalorder %s861_s17, %s921_s2 }
  0x70   : > { %p622_p1 = scmp.lt.u32.totalorder %s620_s4, %s616_s30  ;;  %p624_p2 = scmp.lt.u32.totalorder %s616_s30, %s861_s17 }
  0x71   : > { %p618_p10 = pnand %p617_p9, %p803_p12 }
  0x72   : > { %p623_p6 = por %p622_p1, %p621_p0 }
  0x73   : > { %p619_p11 = pneg %p618_p10 }
  0x74   : > { %p625_p3 = por %p624_p2, %p623_p6 }
  0x76   : > { %p626_p5 = pnand %p625_p3, %p619_p11 }
  0x78   : > { %629 = shalt.err (!%p626_p5)
}
  0x79   : > { %s722_s7 = smov 128   ;;  %s723_s21 = smov 8  }
  0x7a   : > { %460 = dma.vmem_to_hbm [thread:$0]  (%p803_p12), %s863_s20, 512, %s861_s17, %s867_s14, %s722_s7, %s722_s7, %s723_s21  }
  0x7b PF: > { %s338_s8 = sand.u32 1, %s685_s9   ;;  %p927_p4 = scmp.ge.s32.totalorder %s713_s16, 2 }
  0x7c   : > { %s339_s28 = scalar_lea.sflag [#allocation4], %s338_s8 }
  0x7d   : > { %p463_p7 = pnand %p927_p4, %p807_p13 }
  0x7f   : > { %675 = dma.done.wait (!%p463_p7), %s339_s28, 512  }
  0x80   : > { %677 = vsyncadd (!%p463_p7), %s339_s28, 4294966784  ;;  %s21_s16 = sadd.s32 1, %s713_s16   ;;  %s928_s9 = smov %s689_s10 }
  0x81   : > { %p18_p8 = scmp.ge.s32.totalorder %s21_s16, 4   ;;  %s929_s10 = smov %s693_s11 }
  0x82   : > { %s930_s11 = smov %s797_s24  ;;  %s931_s12 = smov %s701_s13 }
  0x83   : > { %s909_s13 = smov 0   ;;  %s932_s14 = smov %s709_s15 }
  0x84   : > { %s933_s15 = smov %s935_s19  ;;  %20 = sbr.rel (!%p18_p8) target bundleno = 9 (0x9), region = 90 }
  0x8b   :  { %344 = vsyncpa [#allocation3], 1 }
  0x8c   :  { %346 = vsyncpa [#allocation3 + $0x1], 1 }
  0x8d   :  { %347 = vsyncpa [#allocation6], 1 }
  0x8e   :  { %349 = vsyncpa [#allocation6 + $0x1], 1 }
  0x8f   :  { %350 = vsyncpa [#allocation4], 1 }
  0x90   :  { %352 = vsyncpa [#allocation4 + $0x1], 1 }

</bundles_post_ra>
